<compile_context>
chip_gen: v7x
topology: tpu7x:2x2x1
jax: 0.10.0
libtpu: 0.0.40
codegen_flags: <defaults>
</compile_context>

<pallas_src>
import jax
import jax.numpy as jnp
from jax.experimental import pallas as pl
from jax.experimental.pallas import tpu as pltpu


# ---------------------------------------------------------------------------
# Buffer construction (the PyTorch __init__), built once — plain JAX.
# ---------------------------------------------------------------------------
def make_position_encoding(d_model: int = 512, max_len: int = 64,
                           dtype=jnp.float32) -> jnp.ndarray:
    """Deterministic sinusoidal PE buffer, identical to the PyTorch __init__."""
    assert d_model % 2 == 0, "d_model must be even for sin/cos interleave"
    position = jnp.arange(0, max_len, dtype=jnp.float32)[:, None]            # (max_len, 1)
    embedding_index = jnp.arange(0, d_model, 2, dtype=jnp.float32)[None, :]  # (1, d_model//2)
    div_term = 1.0 / (10000.0 ** (embedding_index / d_model))                # (1, d_model//2)
    angles = position * div_term                                             # (max_len, d_model//2)
    sin = jnp.sin(angles)
    cos = jnp.cos(angles)
    # Interleave: pe[:, 0::2] = sin, pe[:, 1::2] = cos
    pe = jnp.stack([sin, cos], axis=-1).reshape(max_len, d_model)
    return pe.astype(dtype)


# ---------------------------------------------------------------------------
# Kernel: out = x + pe   (elementwise, HBM-bandwidth bound)
# ---------------------------------------------------------------------------
def add_pe_kernel(x_ref, pe_ref, o_ref):
    # Compute in f32 regardless of streamed dtypes (parity with the f32 torch
    # buffer; the extra VPU casts are hidden under the DMA in a mem-bound add),
    # then cast exactly once at the store.
    x = x_ref[...].astype(jnp.float32)
    p = pe_ref[...].astype(jnp.float32)
    o_ref[...] = (x + p).astype(o_ref.dtype)


# ---------------------------------------------------------------------------
# Tiling helpers
# ---------------------------------------------------------------------------
def _round_up(a: int, m: int) -> int:
    return ((a + m - 1) // m) * m


def _cdiv(a: int, b: int) -> int:
    return (a + b - 1) // b


def _tile_cap_and_vmem_limit():
    """Generation-aware (tile_cap_bytes, vmem_limit_bytes) at trace time."""
    try:
        info = pltpu.get_tpu_info()
        vmem = getattr(info, "vmem_capacity_bytes", None)
        if vmem is not None and vmem >= 96 * 1024 * 1024:
            # v5e / v6e: 128 MiB physical VMEM.  4 MiB tiles -> 3 operands x 2
            # pipeline buffers ~= 24 MiB; raise the scoped limit explicitly
            # (v5e's default is only 16 MiB).
            return 4 * 1024 * 1024, 64 * 1024 * 1024
    except Exception:
        pass
    # Conservative default (covers v7x: 64 MiB physical / 32 MiB scoped):
    # 2 MiB tiles -> ~12 MiB double-buffered, fits the default scoped limit.
    return 2 * 1024 * 1024, None


def _choose_block_rows(seq_len: int, d_model: int, itemsize: int,
                       tile_cap_bytes: int) -> int:
    """Row-tile size: bandwidth sweet spot, vreg-aligned, VMEM-safe, TC-split."""
    align = 16 if itemsize <= 2 else 8          # bf16 packs 16 sublanes/vreg
    padded_seq = _round_up(seq_len, align)
    # ~512 rows f32 / ~1024 rows bf16 hit ~85% of HBM roofline in sweeps.
    target = 1024 if itemsize <= 2 else 512
    # VMEM cap on the tile footprint.
    cap_rows = (tile_cap_bytes // max(1, d_model * itemsize)) // align * align
    target = min(target, max(align, cap_rows))
    # v7x megacore: when there is enough work, make >= 2 row tiles so the
    # "parallel" axis gives each TensorCore its own DMA stream.
    if padded_seq >= 512:
        target = min(target, _round_up(_cdiv(padded_seq, 2), align))
    return max(align, min(target, padded_seq))


# ---------------------------------------------------------------------------
# Forward wrapper
# ---------------------------------------------------------------------------
def position_encoding_forward(x: jnp.ndarray, pe: jnp.ndarray, *,
                              force_pallas: bool = False,
                              donate_x: bool = False,
                              small_fallback_elems: int = 64 * 1024) -> jnp.ndarray:
    """x: (seq_len, d_model) or (batch, seq_len, d_model); pe: (max_len, d_model).

    Returns x + pe[:seq_len] (broadcast over batch), in x.dtype.
    """
    squeeze_batch = False
    if x.ndim == 2:
        x = x[None]                      # metadata-only reshape
        squeeze_batch = True
    assert x.ndim == 3, "x must be (S, D) or (B, S, D)"
    B, S, D = x.shape
    max_len, pe_d = pe.shape
    assert pe_d == D and max_len >= S, "pe must be (max_len >= seq_len, d_model)"

    use_pallas = force_pallas or (B * S * D >= small_fallback_elems)
    if D % 128 != 0:
        # TODO(synk): non-128-multiple d_model would force masked vst partial
        # stores; pad the lane axis or defer to XLA fusion instead.
        use_pallas = False

    if not use_pallas:
        # Tiny shapes: a standalone pallas_call is dominated by launch +
        # pipeline prologue; let XLA fuse the add with neighbors.
        out = (x.astype(jnp.float32)
               + pe[:S].astype(jnp.float32)[None]).astype(x.dtype)
        return out[0] if squeeze_batch else out

    itemsize = jnp.dtype(x.dtype).itemsize
    tile_cap, vmem_limit = _tile_cap_and_vmem_limit()
    block_rows = _choose_block_rows(S, D, itemsize, tile_cap)
    grid = (_cdiv(S, block_rows), B)     # rows outer ("parallel"), batch inner

    # x / out: one (block_rows, D) slab per (row_tile, batch) point.
    x_spec = pl.BlockSpec((None, block_rows, D), lambda r, b: (b, r, 0))
    # pe: indexed over the full (max_len, D) buffer — no wrapper slice/cast.
    # Block index is constant along the inner batch axis, so the pe tile stays
    # resident in VMEM instead of being re-DMA'd B times.
    pe_spec = pl.BlockSpec((block_rows, D), lambda r, b: (r, 0))

    cost = pl.CostEstimate(
        flops=B * S * D,
        transcendentals=0,
        bytes_accessed=2 * B * S * D * itemsize          # x read + out write
                       + S * D * jnp.dtype(pe.dtype).itemsize,  # pe (resident)
    )

    extra_kwargs = {}
    if donate_x:
        # Only beneficial when the caller actually donates x at the jit
        # boundary; otherwise XLA inserts a defensive copy.
        extra_kwargs["input_output_aliases"] = {0: 0}

    out = pl.pallas_call(
        add_pe_kernel,
        out_shape=jax.ShapeDtypeStruct((B, S, D), x.dtype),
        grid=grid,
        in_specs=[x_spec, pe_spec],
        out_specs=x_spec,
        compiler_params=pltpu.CompilerParams(
            dimension_semantics=("parallel", "arbitrary"),
            vmem_limit_bytes=vmem_limit,
        ),
        cost_estimate=cost,
        **extra_kwargs,
    )(x, pe)

    return out[0] if squeeze_batch else out


# ---------------------------------------------------------------------------
# Demo / self-test
# ---------------------------------------------------------------------------
if __name__ == "__main__":
    d_model, max_len = 512, 64           # module defaults; lane-dense (512 = 4*128)
    pe = make_position_encoding(d_model=d_model, max_len=max_len, dtype=jnp.float32)

    key = jax.random.PRNGKey(0)
    k1, k2, k3 = jax.random.split(key, 3)

    # 1) Module-default unbatched shape (seq=64, d_model=512), f32, Pallas path.
    seq_len = 64
    x = jax.random.normal(k1, (seq_len, d_model), dtype=jnp.float32)
    out = jax.block_until_ready(
        position_encoding_forward(x, pe, force_pallas=True))
    ref = x + pe[:seq_len, :]
    assert out.shape == (seq_len, d_model) and out.dtype == x.dtype
    assert jnp.allclose(out, ref, atol=1e-6, rtol=1e-6)

    # 2) Batched input (B=2, S=32): pe stays resident across the batch axis.
    xb = jax.random.normal(k2, (2, 32, d_model), dtype=jnp.float32)
    outb = jax.block_until_ready(
        position_encoding_forward(xb, pe, force_pallas=True))
    refb = xb + pe[None, :32, :]
    assert outb.shape == xb.shape
    assert jnp.allclose(outb, refb, atol=1e-6, rtol=1e-6)

    # 3) bf16 activations with the f32 buffer: in-kernel promotion, one cast at store.
    x_bf16 = x.astype(jnp.bfloat16)
    out_bf16 = jax.block_until_ready(
        position_encoding_forward(x_bf16, pe, force_pallas=True))
    ref_bf16 = (x_bf16.astype(jnp.float32) + pe[:seq_len, :]).astype(jnp.bfloat16)
    assert out_bf16.dtype == jnp.bfloat16
    assert jnp.allclose(out_bf16.astype(jnp.float32),
                        ref_bf16.astype(jnp.float32), atol=1e-2, rtol=1e-2)

    # 4) Non-multiple-of-8 sequence (padded/masked trailing tile), Pallas path.
    seq7 = 7
    x7 = jax.random.normal(k3, (seq7, d_model), dtype=jnp.float32)
    out7 = jax.block_until_ready(
        position_encoding_forward(x7, pe, force_pallas=True))
    assert jnp.allclose(out7, x7 + pe[:seq7, :], atol=1e-6, rtol=1e-6)

    # 5) Small-shape XLA-fusion fallback agrees with the kernel path.
    out_fb = jax.block_until_ready(position_encoding_forward(x, pe))
    assert jnp.allclose(out_fb, ref, atol=1e-6, rtol=1e-6)

    print("KERNEL_OK")
</pallas_src>

<mosaic_0001>
module attributes {stable_mosaic.version = 11 : i64} {
  func.func @add_pe_kernel(%arg0: i32, %arg1: i32, %arg2: memref<1x64x512xf32, #tpu.memory_space<vmem>>, %arg3: memref<64x512xf32, #tpu.memory_space<vmem>>, %arg4: memref<1x64x512xf32, #tpu.memory_space<vmem>>) attributes {dimension_semantics = [#tpu.dimension_semantics<parallel>, #tpu.dimension_semantics<arbitrary>], iteration_bounds = array<i64: 1, 1>, scalar_prefetch = 0 : i64, scratch_operands = 0 : i64, tpu.core_type = #tpu.core_type<tc>, window_params = [{transform_indices = @transform_0, window_bounds = array<i64: 1, 64, 512>}, {transform_indices = @transform_1, window_bounds = array<i64: 64, 512>}, {transform_indices = @transform_2, window_bounds = array<i64: 1, 64, 512>}]} {
    %c0 = arith.constant 0 : index
    %c0_0 = arith.constant 0 : index
    %c0_1 = arith.constant 0 : index
    %0 = vector.load %arg2[%c0, %c0_0, %c0_1] : memref<1x64x512xf32, #tpu.memory_space<vmem>>, vector<1x64x512xf32>
    %1 = vector.shape_cast %0 : vector<1x64x512xf32> to vector<64x512xf32>
    %c0_2 = arith.constant 0 : index
    %c0_3 = arith.constant 0 : index
    %2 = vector.load %arg3[%c0_2, %c0_3] : memref<64x512xf32, #tpu.memory_space<vmem>>, vector<64x512xf32>
    %3 = arith.addf %1, %2 : vector<64x512xf32>
    %c0_4 = arith.constant 0 : index
    %c0_5 = arith.constant 0 : index
    %c0_6 = arith.constant 0 : index
    %4 = vector.load %arg4[%c0_4, %c0_5, %c0_6] : memref<1x64x512xf32, #tpu.memory_space<vmem>>, vector<1x64x512xf32>
    %5 = vector.shape_cast %4 : vector<1x64x512xf32> to vector<64x512xf32>
    %6 = vector.shape_cast %3 : vector<64x512xf32> to vector<1x64x512xf32>
    tpu.vector_store %arg4[%c0_4, %c0_5, %c0_6], %6 {strides = array<i32>} : memref<1x64x512xf32, #tpu.memory_space<vmem>>, vector<1x64x512xf32>,
    return
  }
  func.func @transform_0(%arg0: i32, %arg1: i32) -> (i32, i32, i32) {
    %c0_i32 = arith.constant 0 : i32
    %c0_i32_0 = arith.constant 0 : i32
    return %arg1, %arg0, %c0_i32 : i32, i32, i32
  }
  func.func @transform_1(%arg0: i32, %arg1: i32) -> (i32, i32) {
    %c0_i32 = arith.constant 0 : i32
    %c0_i32_0 = arith.constant 0 : i32
    return %arg0, %c0_i32 : i32, i32
  }
  func.func @transform_2(%arg0: i32, %arg1: i32) -> (i32, i32, i32) {
    %c0_i32 = arith.constant 0 : i32
    %c0_i32_0 = arith.constant 0 : i32
    return %arg1, %arg0, %c0_i32 : i32, i32, i32
  }
}

</mosaic_0001>

<bundles_post_ra>
// kernel: tpu_custom_call.1
= control target key start
LH: loop header
LB: loop body
LE: loop exit
PB: predicated region body
PF: predicated region fallthrough
CT: control target
= control target key end

     0   :  { %7 = vsyncpa [#allocation3], 0  ;;  %s328_s0 = inlined_call_operand.hbm [shape: f32[1,64,512], index: 0, kind: input, shape index: {}]   ;;  %s329_s1 = inlined_call_operand.hbm [shape: f32[64,512], index: 1, kind: input, shape index: {}]   ;;  %s330_s2 = inlined_call_operand.hbm [shape: f32[1,64,512], index: 2, kind: output, shape index: {}]  }
   0x1   :  { %8 = vsyncpa [#allocation6], 0 }
   0x2   :  { %9 = vsyncpa [#allocation4], 0  ;;  %s263_s9 = smov [#allocation2]   ;;  %s191_s13 = scalar_lea.hbm %s328_s0, 4096 }
   0x3   :  { %s15_s10 = sshll.u32 %s263_s9, 4  ;;  %p192_p0 = scmp.ne.s32.totalorder %s328_s0, %s191_s13  ;;  %s16_s10 = int_to_ptr.vmem [resolvable:$true] %s15_s10 }
   0x4   :  { %p195_p1 = scmp.lt.u32.totalorder %s191_s13, %s328_s0 }
   0x6   :  { %p197_p2 = pnand %p195_p1, %p192_p0 }
   0x8   :  { %200 = shalt.err (!%p197_p2)
}
   0x9   :  { %s201_s18 = scalar_lea.vmem %s16_s10, 4096  ;;  %p206_p4 = scmp.lt.s32.totalorder %s16_s10, %s16_s10 }
   0xa   :  { %p202_p3 = scmp.ne.s32.totalorder %s16_s10, %s201_s18  ;;  %p207_p5 = scmp.lt.s32.totalorder %s201_s18, %s201_s18 }
   0xc   :  { %p208_p6 = por %p207_p5, %p206_p4 }
   0xe   :  { %p209_p7 = pnand %p208_p6, %p202_p3 }
  0x10   :  { %212 = shalt.err (!%p209_p7)
}
  0x11   :  { %s264_s19 = smov 512   ;;  %s265_s20 = smov 32  }
  0x12   :  { %21 = dma.hbm_to_vmem [thread:$0]  %s328_s0, 4096, %s16_s10, [#allocation3], %s264_s19, %s264_s19, %s265_s20  }
  0x13   :  { %s266_s23 = smov [#allocation5]   ;;  %s213_s27 = scalar_lea.hbm %s329_s1, 4096 }
  0x14   :  { %s27_s24 = sshll.u32 %s266_s23, 4  ;;  %p214_p8 = scmp.ne.s32.totalorder %s329_s1, %s213_s27  ;;  %s28_s24 = int_to_ptr.vmem [resolvable:$true] %s27_s24 }
  0x15   :  { %p217_p9 = scmp.lt.u32.totalorder %s213_s27, %s329_s1 }
  0x17   :  { %p219_p10 = pnand %p217_p9, %p214_p8 }
  0x19   :  { %222 = shalt.err (!%p219_p10)
}
  0x1a   :  { %s223_s4 = scalar_lea.vmem %s28_s24, 4096  ;;  %p228_p12 = scmp.lt.s32.totalorder %s28_s24, %s28_s24 }
  0x1b   :  { %p224_p11 = scmp.ne.s32.totalorder %s28_s24, %s223_s4  ;;  %p229_p13 = scmp.lt.s32.totalorder %s223_s4, %s223_s4 }
  0x1d   :  { %p230_p0 = por %p229_p13, %p228_p12 }
  0x1f   :  { %p231_p1 = pnand %p230_p0, %p224_p11 }
  0x21   :  { %234 = shalt.err (!%p231_p1)
}
  0x22   :  { %33 = dma.hbm_to_vmem [thread:$0]  %s329_s1, 4096, %s28_s24, [#allocation6], %s264_s19, %s264_s19, %s265_s20  }
  0x23   :  { %257 = dma.done.wait [#allocation3], 4096  }
  0x24   :  { %258 = vsyncadd [#allocation3], 4294963200 }
  0x25   :  { %259 = dma.done.wait [#allocation6], 4096  }
  0x26   :  { %260 = vsyncadd [#allocation6], 4294963200  ;;  %v40_v0 = vld [vmem:[#allocation2] sm:$0xff]  ;;  %v41_v2 = vld [vmem:[#allocation2 + $0x8] sm:$0xff]  ;;  %s267_s1 = smov [#allocation7]  }
  0x27   :  { %v72_v1 = vld [vmem:[#allocation5] sm:$0xff]  ;;  %v73_v4 = vld [vmem:[#allocation5 + $0x8] sm:$0xff]  ;;  %v42_v5 = vld [vmem:[#allocation2 + $0x10] sm:$0xff]  ;;  %s173_s6 = sshll.u32 %s267_s1, 4  ;;  %s174_s6 = int_to_ptr.vmem [resolvable:$true] %s173_s6 }
  0x28   :  { %v104_v3 = vadd.f32 %v72_v1, %v40_v0  ;;  %v74_v6 = vld [vmem:[#allocation5 + $0x10] sm:$0xff]  ;;  %v105_v7 = vadd.f32 %v73_v4, %v41_v2  ;;  %v43_v9 = vld [vmem:[#allocation2 + $0x18] sm:$0xff]  ;;  %v44_v11 = vld [vmem:[#allocation2 + $0x20] sm:$0xff]  ;;  %s235_s7 = scalar_lea.vmem %s174_s6, 4096  ;;  %p240_p3 = scmp.lt.s32.totalorder %s174_s6, %s174_s6 }
  0x29   :  { %v106_v8 = vadd.f32 %v74_v6, %v42_v5  ;;  %v75_v10 = vld [vmem:[#allocation5 + $0x18] sm:$0xff]  ;;  %v76_v13 = vld [vmem:[#allocation5 + $0x20] sm:$0xff]  ;;  %v45_v14 = vld [vmem:[#allocation2 + $0x28] sm:$0xff]  ;;  %p236_p2 = scmp.ne.s32.totalorder %s174_s6, %s235_s7  ;;  %p241_p4 = scmp.lt.s32.totalorder %s235_s7, %s235_s7 }
  0x2a   :  { %136 = vst [vmem:[#allocation7] sm:$0xff] %v104_v3  ;;  %v107_v12 = vadd.f32 %v75_v10, %v43_v9  ;;  %v77_v15 = vld [vmem:[#allocation5 + $0x28] sm:$0xff]  ;;  %137 = vst [vmem:[#allocation7 + $0x8] sm:$0xff] %v105_v7  ;;  %v108_v16 = vadd.f32 %v76_v13, %v44_v11  ;;  %v46_v18 = vld [vmem:[#allocation2 + $0x30] sm:$0xff] }
  0x2b   :  { %138 = vst [vmem:[#allocation7 + $0x10] sm:$0xff] %v106_v8  ;;  %v109_v17 = vadd.f32 %v77_v15, %v45_v14  ;;  %v78_v19 = vld [vmem:[#allocation5 + $0x30] sm:$0xff]  ;;  %v47_v20 = vld [vmem:[#allocation2 + $0x38] sm:$0xff]  ;;  %v48_v23 = vld [vmem:[#allocation2 + $0x40] sm:$0xff]  ;;  %p242_p5 = por %p241_p4, %p240_p3 }
  0x2c   :  { %139 = vst [vmem:[#allocation7 + $0x18] sm:$0xff] %v107_v12  ;;  %v110_v21 = vadd.f32 %v78_v19, %v46_v18  ;;  %v79_v22 = vld [vmem:[#allocation5 + $0x38] sm:$0xff]  ;;  %v80_v24 = vld [vmem:[#allocation5 + $0x40] sm:$0xff]  ;;  %140 = vst [vmem:[#allocation7 + $0x20] sm:$0xff] %v108_v16 }
  0x2d   :  { %141 = vst [vmem:[#allocation7 + $0x28] sm:$0xff] %v109_v17  ;;  %v111_v25 = vadd.f32 %v79_v22, %v47_v20  ;;  %v112_v26 = vadd.f32 %v80_v24, %v48_v23  ;;  %v49_v27 = vld [vmem:[#allocation2 + $0x48] sm:$0xff]  ;;  %v50_v29 = vld [vmem:[#allocation2 + $0x50] sm:$0xff]  ;;  %v51_v32 = vld [vmem:[#allocation2 + $0x58] sm:$0xff]  ;;  %p243_p6 = pnand %p242_p5, %p236_p2 }
  0x2e   :  { %v81_v28 = vld [vmem:[#allocation5 + $0x48] sm:$0xff]  ;;  %142 = vst [vmem:[#allocation7 + $0x30] sm:$0xff] %v110_v21  ;;  %v82_v31 = vld [vmem:[#allocation5 + $0x50] sm:$0xff]  ;;  %v83_v33 = vld [vmem:[#allocation5 + $0x58] sm:$0xff] }
  0x2f   :  { %v113_v30 = vadd.f32 %v81_v28, %v49_v27  ;;  %143 = vst [vmem:[#allocation7 + $0x38] sm:$0xff] %v111_v25  ;;  %144 = vst [vmem:[#allocation7 + $0x40] sm:$0xff] %v112_v26  ;;  %v114_v34 = vadd.f32 %v82_v31, %v50_v29  ;;  %v115_v35 = vadd.f32 %v83_v33, %v51_v32  ;;  %v52_v36 = vld [vmem:[#allocation2 + $0x60] sm:$0xff]  ;;  %v53_v38 = vld [vmem:[#allocation2 + $0x68] sm:$0xff] }
  0x30   :  { %v84_v37 = vld [vmem:[#allocation5 + $0x60] sm:$0xff]  ;;  %v85_v40 = vld [vmem:[#allocation5 + $0x68] sm:$0xff]  ;;  %v54_v41 = vld [vmem:[#allocation2 + $0x70] sm:$0xff] }
  0x31   :  { %145 = vst [vmem:[#allocation7 + $0x48] sm:$0xff] %v113_v30  ;;  %v116_v39 = vadd.f32 %v84_v37, %v52_v36  ;;  %v86_v42 = vld [vmem:[#allocation5 + $0x70] sm:$0xff]  ;;  %146 = vst [vmem:[#allocation7 + $0x50] sm:$0xff] %v114_v34  ;;  %v117_v43 = vadd.f32 %v85_v40, %v53_v38  ;;  %v55_v45 = vld [vmem:[#allocation2 + $0x78] sm:$0xff] }
  0x32   :  { %147 = vst [vmem:[#allocation7 + $0x58] sm:$0xff] %v115_v35  ;;  %v118_v44 = vadd.f32 %v86_v42, %v54_v41  ;;  %v87_v46 = vld [vmem:[#allocation5 + $0x78] sm:$0xff]  ;;  %v56_v47 = vld [vmem:[#allocation2 + $0x80] sm:$0xff]  ;;  %v57_v50 = vld [vmem:[#allocation2 + $0x88] sm:$0xff] }
  0x33   :  { %148 = vst [vmem:[#allocation7 + $0x60] sm:$0xff] %v116_v39  ;;  %v119_v48 = vadd.f32 %v87_v46, %v55_v45  ;;  %v88_v49 = vld [vmem:[#allocation5 + $0x80] sm:$0xff]  ;;  %v89_v51 = vld [vmem:[#allocation5 + $0x88] sm:$0xff]  ;;  %149 = vst [vmem:[#allocation7 + $0x68] sm:$0xff] %v117_v43 }
  0x34   :  { %150 = vst [vmem:[#allocation7 + $0x70] sm:$0xff] %v118_v44  ;;  %v120_v52 = vadd.f32 %v88_v49, %v56_v47  ;;  %v121_v53 = vadd.f32 %v89_v51, %v57_v50  ;;  %v58_v54 = vld [vmem:[#allocation2 + $0x90] sm:$0xff]  ;;  %v59_v56 = vld [vmem:[#allocation2 + $0x98] sm:$0xff]  ;;  %v60_v59 = vld [vmem:[#allocation2 + $0xa0] sm:$0xff] }
  0x35   :  { %v90_v55 = vld [vmem:[#allocation5 + $0x90] sm:$0xff]  ;;  %151 = vst [vmem:[#allocation7 + $0x78] sm:$0xff] %v119_v48  ;;  %v91_v58 = vld [vmem:[#allocation5 + $0x98] sm:$0xff]  ;;  %v92_v60 = vld [vmem:[#allocation5 + $0xa0] sm:$0xff] }
  0x36   :  { %v122_v57 = vadd.f32 %v90_v55, %v58_v54  ;;  %152 = vst [vmem:[#allocation7 + $0x80] sm:$0xff] %v120_v52  ;;  %153 = vst [vmem:[#allocation7 + $0x88] sm:$0xff] %v121_v53  ;;  %v123_v61 = vadd.f32 %v91_v58, %v59_v56  ;;  %v124_v62 = vadd.f32 %v92_v60, %v60_v59  ;;  %v61_v63 = vld [vmem:[#allocation2 + $0xa8] sm:$0xff]  ;;  %v62_v1 = vld [vmem:[#allocation2 + $0xb0] sm:$0xff] }
  0x37   :  { %v93_v0 = vld [vmem:[#allocation5 + $0xa8] sm:$0xff]  ;;  %v94_v3 = vld [vmem:[#allocation5 + $0xb0] sm:$0xff]  ;;  %v63_v4 = vld [vmem:[#allocation2 + $0xb8] sm:$0xff] }
  0x38   :  { %154 = vst [vmem:[#allocation7 + $0x90] sm:$0xff] %v122_v57  ;;  %v125_v2 = vadd.f32 %v93_v0, %v61_v63  ;;  %v95_v5 = vld [vmem:[#allocation5 + $0xb8] sm:$0xff]  ;;  %155 = vst [vmem:[#allocation7 + $0x98] sm:$0xff] %v123_v61  ;;  %v126_v6 = vadd.f32 %v94_v3, %v62_v1  ;;  %v64_v8 = vld [vmem:[#allocation2 + $0xc0] sm:$0xff] }
  0x39   :  { %156 = vst [vmem:[#allocation7 + $0xa0] sm:$0xff] %v124_v62  ;;  %v127_v7 = vadd.f32 %v95_v5, %v63_v4  ;;  %v96_v9 = vld [vmem:[#allocation5 + $0xc0] sm:$0xff]  ;;  %v65_v10 = vld [vmem:[#allocation2 + $0xc8] sm:$0xff]  ;;  %v66_v13 = vld [vmem:[#allocation2 + $0xd0] sm:$0xff] }
  0x3a   :  { %157 = vst [vmem:[#allocation7 + $0xa8] sm:$0xff] %v125_v2  ;;  %v128_v11 = vadd.f32 %v96_v9, %v64_v8  ;;  %v97_v12 = vld [vmem:[#allocation5 + $0xc8] sm:$0xff]  ;;  %v98_v14 = vld [vmem:[#allocation5 + $0xd0] sm:$0xff]  ;;  %158 = vst [vmem:[#allocation7 + $0xb0] sm:$0xff] %v126_v6 }
  0x3b   :  { %159 = vst [vmem:[#allocation7 + $0xb8] sm:$0xff] %v127_v7  ;;  %v129_v15 = vadd.f32 %v97_v12, %v65_v10  ;;  %v130_v16 = vadd.f32 %v98_v14, %v66_v13  ;;  %v67_v17 = vld [vmem:[#allocation2 + $0xd8] sm:$0xff]  ;;  %v68_v19 = vld [vmem:[#allocation2 + $0xe0] sm:$0xff]  ;;  %v69_v22 = vld [vmem:[#allocation2 + $0xe8] sm:$0xff] }
  0x3c   :  { %v99_v18 = vld [vmem:[#allocation5 + $0xd8] sm:$0xff]  ;;  %160 = vst [vmem:[#allocation7 + $0xc0] sm:$0xff] %v128_v11  ;;  %v100_v21 = vld [vmem:[#allocation5 + $0xe0] sm:$0xff]  ;;  %v101_v23 = vld [vmem:[#allocation5 + $0xe8] sm:$0xff] }
  0x3d   :  { %v131_v20 = vadd.f32 %v99_v18, %v67_v17  ;;  %161 = vst [vmem:[#allocation7 + $0xc8] sm:$0xff] %v129_v15  ;;  %162 = vst [vmem:[#allocation7 + $0xd0] sm:$0xff] %v130_v16  ;;  %v132_v24 = vadd.f32 %v100_v21, %v68_v19  ;;  %v133_v25 = vadd.f32 %v101_v23, %v69_v22  ;;  %v70_v26 = vld [vmem:[#allocation2 + $0xf0] sm:$0xff]  ;;  %v71_v28 = vld [vmem:[#allocation2 + $0xf8] sm:$0xff] }
  0x3e   :  { %v102_v27 = vld [vmem:[#allocation5 + $0xf0] sm:$0xff]  ;;  %v103_v30 = vld [vmem:[#allocation5 + $0xf8] sm:$0xff] }
  0x3f   :  { %163 = vst [vmem:[#allocation7 + $0xd8] sm:$0xff] %v131_v20  ;;  %v134_v29 = vadd.f32 %v102_v27, %v70_v26  ;;  %164 = vst [vmem:[#allocation7 + $0xe0] sm:$0xff] %v132_v24  ;;  %v135_v31 = vadd.f32 %v103_v30, %v71_v28 }
  0x40   :  { %165 = vst [vmem:[#allocation7 + $0xe8] sm:$0xff] %v133_v25 }
  0x41   :  { %166 = vst [vmem:[#allocation7 + $0xf0] sm:$0xff] %v134_v29  ;;  %167 = vst [vmem:[#allocation7 + $0xf8] sm:$0xff] %v135_v31 }
  0x42   :  { %246 = shalt.err (!%p243_p6)
}
  0x43   :  { %s247_s10 = scalar_lea.hbm %s330_s2, 4096 }
  0x44   :  { %p248_p7 = scmp.ne.s32.totalorder %s330_s2, %s247_s10  ;;  %p251_p8 = scmp.lt.u32.totalorder %s247_s10, %s330_s2 }
  0x46   :  { %p253_p9 = pnand %p251_p8, %p248_p7 }
  0x48   :  { %256 = shalt.err (!%p253_p9)
}
  0x49   :  { %179 = dma.vmem_to_hbm [thread:$0]  %s174_s6, 4096, %s330_s2, [#allocation4], %s264_s19, %s264_s19, %s265_s20  }
  0x4a   :  { %261 = dma.done.wait [#allocation4], 4096  }
  0x4b   :  { %262 = vsyncadd [#allocation4], 4294963200 }
  0x4c   :  { %183 = vsyncpa [#allocation3], 1 }
  0x4d   :  { %184 = vsyncpa [#allocation6], 1 }
  0x4e   :  { %185 = vsyncpa [#allocation4], 1 }

</bundles_post_ra>
